<compile_context>
chip_gen: v5e
topology: v5e:2x2
jax: 0.10.0
libtpu: 0.0.40
codegen_flags: <defaults>
</compile_context>

<pallas_src>
import functools

import numpy as np
import jax
import jax.numpy as jnp
from jax import lax
from jax.experimental import pallas as pl
from jax.experimental.pallas import tpu as pltpu


def _ema_chunk_kernel(l_ref, p_ref, x_ref, o_ref, state_ref, *,
                      t_block, t_total, b_block, ragged_t):
    """Process one (b_block, t_block, C) tile.

    l_ref:     (t_block, t_block) lower-triangular EMA weights (constant)
    p_ref:     (t_block, 1)       carry-in weights (constant)
    x_ref:     (b_block, t_block, C) input tile
    o_ref:     (b_block, t_block, C) output tile
    state_ref: (b_block, 1, C) VMEM scratch carrying EMA state across chunks
    """
    t_idx = pl.program_id(1)

    @pl.when(t_idx == 0)
    def _():
        # state = 0  =>  out[0] = alpha * x[0]  (the reference's t == 0 branch)
        state_ref[...] = jnp.zeros_like(state_ref)

    l_mat = l_ref[...]        # (tT, tT)
    p_vec = p_ref[...]        # (tT, 1)

    if ragged_t:
        row = lax.broadcasted_iota(jnp.int32, (t_block, 1), 0)
        valid = (t_idx * t_block + row) < t_total          # (tT, 1) bool
    else:
        valid = None

    for b in range(b_block):  # static, small; independent recurrences per batch
        xb = x_ref[b]                                       # (tT, C)
        if valid is not None:
            xb = jnp.where(valid, xb, jnp.zeros_like(xb))
        # Entire dependent time chain as a single MXU matmul.
        y = jnp.dot(l_mat, xb, preferred_element_type=jnp.float32)  # (tT, C)
        y = y + p_vec * state_ref[b]                        # (tT,1)*(1,C) bcast
        o_ref[b] = y.astype(o_ref.dtype)                    # dense tile store
        # Carry = last row of this chunk.  For the ragged tail it holds junk,
        # but it is never consumed (next batch block re-zeroes at t_idx == 0).
        state_ref[b] = y[t_block - 1:t_block, :]


def _default_time_block():
    # v5e MXU is 4x128^2 -> prefer 128-wide L tiles there; 256 on v6e/v7x.
    try:
        kind = jax.devices()[0].device_kind.lower()
        if "v5 lite" in kind or "v5e" in kind or "v5lite" in kind:
            return 128
    except Exception:
        pass
    return 256


def ema_forward(x, alpha, *, t_block_target=None, tile_bytes_target=1 << 20):
    """EMA over the time axis of x: [B, T, C] float32 -> [B, T, C] float32."""
    assert x.ndim == 3, "expected [B, T, C]"
    B, T, C = x.shape
    x = x.astype(jnp.float32)

    if t_block_target is None:
        t_block_target = _default_time_block()

    # ---- time block: multiple of 8 (or == T); cap so (tT, C) slab stays small.
    tT = min(T, t_block_target)
    if tT != T and tT % 8 != 0:
        tT = max(8, (tT // 8) * 8)
    max_tile_bytes = 4 << 20
    while tT != T and tT > 8 and tT * C * 4 > max_tile_bytes:
        tT = max(8, ((tT // 2) // 8) * 8)
    n_t = pl.cdiv(T, tT)
    ragged_t = (T % tT) != 0

    # ---- batch block: ~1 MiB tiles, but keep >= 2 batch blocks when B >= 2
    # so v7x's second TensorCore has work (no-op on single-TC v5e/v6e).
    b_blk = max(1, min(B, tile_bytes_target // max(1, tT * C * 4)))
    if B >= 2:
        b_blk = min(b_blk, max(1, B // 2))
    while B % b_blk != 0:        # exact batch blocking (no ragged batch tiles)
        b_blk -= 1
    n_b = B // b_blk

    # ---- constant recurrence operators, built once at trace time.
    idx = np.arange(tT)
    diff = idx[:, None] - idx[None, :]
    one_minus = 1.0 - float(alpha)
    l_mat = np.where(diff >= 0,
                     float(alpha) * np.power(one_minus, np.maximum(diff, 0)),
                     0.0).astype(np.float32)                       # (tT, tT)
    p_vec = np.power(one_minus, idx + 1).astype(np.float32).reshape(tT, 1)

    kernel = functools.partial(
        _ema_chunk_kernel,
        t_block=tT, t_total=T, b_block=b_blk, ragged_t=ragged_t)

    tile_bytes = b_blk * tT * C * 4
    const_bytes = (tT * tT + tT) * 4
    vmem_limit = int(min(
        48 << 20,
        max(16 << 20,
            4 * tile_bytes + 2 * const_bytes + b_blk * C * 4 + (2 << 20))))

    cost = pl.CostEstimate(
        flops=2 * B * n_t * tT * tT * C,        # dominated by L @ X
        transcendentals=0,
        bytes_accessed=2 * B * T * C * 4,       # streaming, HBM-bound
    )

    return pl.pallas_call(
        kernel,
        out_shape=jax.ShapeDtypeStruct((B, T, C), jnp.float32),
        grid=(n_b, n_t),
        in_specs=[
            pl.BlockSpec((tT, tT), lambda b, t: (0, 0)),          # L (constant)
            pl.BlockSpec((tT, 1), lambda b, t: (0, 0)),           # p (constant)
            pl.BlockSpec((b_blk, tT, C), lambda b, t: (b, t, 0)),  # x
        ],
        out_specs=pl.BlockSpec((b_blk, tT, C), lambda b, t: (b, t, 0)),
        scratch_shapes=[pltpu.VMEM((b_blk, 1, C), jnp.float32)],
        compiler_params=pltpu.CompilerParams(
            # B blocks independent; T carries the recurrence (must stay
            # innermost + "arbitrary" so the VMEM state persists in order).
            dimension_semantics=("parallel", "arbitrary"),
            vmem_limit_bytes=vmem_limit,
        ),
        cost_estimate=cost,
    )(jnp.asarray(l_mat), jnp.asarray(p_vec), x)


def ema_reference(x, alpha):
    """Pure-JAX reference matching the PyTorch loop semantics."""
    a0 = jnp.float32(alpha)
    a1 = jnp.float32(1.0 - alpha)

    def step(carry, x_t):
        y = a1 * carry + a0 * x_t
        return y, y

    x_tbc = jnp.transpose(x, (1, 0, 2))  # [T, B, C]
    y0 = a0 * x_tbc[0]
    _, rest = lax.scan(step, y0, x_tbc[1:])
    out = jnp.concatenate([y0[None], rest], axis=0)
    return jnp.transpose(out, (1, 0, 2))


if __name__ == "__main__":
    ALPHA = 0.3
    B, T, C = 2, 8, 32  # small shapes: batch=2, seq=8, channels=32

    key = jax.random.PRNGKey(0)
    x = jax.random.normal(key, (B, T, C), dtype=jnp.float32)

    # The module's ema0 = alpha, ema1 = 1 - alpha buffers are fixed constants;
    # they are folded into the L / p recurrence operators above.
    out = ema_forward(x, ALPHA)
    out = jax.block_until_ready(out)

    ref = ema_reference(x, ALPHA)
    assert out.shape == (B, T, C)
    assert out.dtype == jnp.float32
    # Matmul reformulation matches the sequential scan to ~f32 rounding level.
    assert jnp.allclose(out, ref, atol=1e-5, rtol=1e-5), "mismatch vs reference"

    print("KERNEL_OK")
</pallas_src>

<mosaic_0001>
module attributes {stable_mosaic.version = 11 : i64} {
  func.func @_ema_chunk_kernel(%arg0: i32, %arg1: i32, %arg2: memref<8x8xf32, #tpu.memory_space<vmem>>, %arg3: memref<8x1xf32, #tpu.memory_space<vmem>>, %arg4: memref<1x8x32xf32, #tpu.memory_space<vmem>>, %arg5: memref<1x8x32xf32, #tpu.memory_space<vmem>>, %arg6: memref<1x1x32xf32, #tpu.memory_space<vmem>>) attributes {dimension_semantics = [#tpu.dimension_semantics<parallel>, #tpu.dimension_semantics<arbitrary>], iteration_bounds = array<i64: 2, 1>, scalar_prefetch = 0 : i64, scratch_operands = 1 : i64, tpu.core_type = #tpu.core_type<tc>, window_params = [{pipeline_mode = #tpu.pipeline_mode<synchronous>, transform_indices = @transform_0, window_bounds = array<i64: 8, 8>}, {pipeline_mode = #tpu.pipeline_mode<synchronous>, transform_indices = @transform_1, window_bounds = array<i64: 8, 1>}, {transform_indices = @transform_2, window_bounds = array<i64: 1, 8, 32>}, {transform_indices = @transform_3, window_bounds = array<i64: 1, 8, 32>}]} {
    %c0_i32 = arith.constant 0 : i32
    %0 = arith.cmpi eq, %arg1, %c0_i32 : i32
    %1 = arith.extui %0 : i1 to i32
    %c0_i32_0 = arith.constant 0 : i32
    %2 = arith.cmpi ne, %1, %c0_i32_0 : i32
    scf.if %2 {
      %cst_16 = arith.constant 0.000000e+00 : f32
      %21 = vector.broadcast %cst_16 : f32 to vector<1x1x32xf32>
      %c0_17 = arith.constant 0 : index
      %c0_18 = arith.constant 0 : index
      %c0_19 = arith.constant 0 : index
      %22 = vector.load %arg6[%c0_17, %c0_18, %c0_19] : memref<1x1x32xf32, #tpu.memory_space<vmem>>, vector<1x1x32xf32>
      tpu.vector_store %arg6[%c0_17, %c0_18, %c0_19], %21 {strides = array<i32>} : memref<1x1x32xf32, #tpu.memory_space<vmem>>, vector<1x1x32xf32>,
    } else {
    }
    %c0 = arith.constant 0 : index
    %c0_1 = arith.constant 0 : index
    %3 = vector.load %arg2[%c0, %c0_1] : memref<8x8xf32, #tpu.memory_space<vmem>>, vector<8x8xf32>
    %c0_2 = arith.constant 0 : index
    %c0_3 = arith.constant 0 : index
    %4 = vector.load %arg3[%c0_2, %c0_3] : memref<8x1xf32, #tpu.memory_space<vmem>>, vector<8x1xf32>
    %c0_4 = arith.constant 0 : index
    %c0_5 = arith.constant 0 : index
    %c0_6 = arith.constant 0 : index
    %5 = vector.load %arg4[%c0_4, %c0_5, %c0_6] : memref<1x8x32xf32, #tpu.memory_space<vmem>>, vector<1x8x32xf32>
    %6 = vector.shape_cast %5 : vector<1x8x32xf32> to vector<8x32xf32>
    %cst = arith.constant dense<0.000000e+00> : vector<8x32xf32>
    %7 = tpu.matmul %3, %6, %cst {dimension_numbers = #tpu.dot_dimension_numbers<[1], [0], [0], [1], [0, 0, 1, 1], [], []>} : vector<8x8xf32>, vector<8x32xf32>, vector<8x32xf32> -> vector<8x32xf32>
    %c0_7 = arith.constant 0 : index
    %c0_8 = arith.constant 0 : index
    %c0_9 = arith.constant 0 : index
    %8 = vector.load %arg6[%c0_7, %c0_8, %c0_9] : memref<1x1x32xf32, #tpu.memory_space<vmem>>, vector<1x1x32xf32>
    %9 = vector.shape_cast %8 : vector<1x1x32xf32> to vector<1x32xf32>
    %10 = vector.broadcast %4 : vector<8x1xf32> to vector<8x32xf32>
    %11 = vector.broadcast %9 : vector<1x32xf32> to vector<8x32xf32>
    %12 = arith.mulf %10, %11 : vector<8x32xf32>
    %13 = arith.addf %7, %12 : vector<8x32xf32>
    %c0_10 = arith.constant 0 : index
    %c0_11 = arith.constant 0 : index
    %c0_12 = arith.constant 0 : index
    %14 = vector.load %arg5[%c0_10, %c0_11, %c0_12] : memref<1x8x32xf32, #tpu.memory_space<vmem>>, vector<1x8x32xf32>
    %15 = vector.shape_cast %14 : vector<1x8x32xf32> to vector<8x32xf32>
    %16 = vector.shape_cast %13 : vector<8x32xf32> to vector<1x8x32xf32>
    tpu.vector_store %arg5[%c0_10, %c0_11, %c0_12], %16 {strides = array<i32>} : memref<1x8x32xf32, #tpu.memory_space<vmem>>, vector<1x8x32xf32>,
    %17 = vector.extract_strided_slice %13 {offsets = [7, 0], sizes = [1, 32], strides = [1, 1]} : vector<8x32xf32> to vector<1x32xf32>
    %c0_13 = arith.constant 0 : index
    %c0_14 = arith.constant 0 : index
    %c0_15 = arith.constant 0 : index
    %18 = vector.load %arg6[%c0_13, %c0_14, %c0_15] : memref<1x1x32xf32, #tpu.memory_space<vmem>>, vector<1x1x32xf32>
    %19 = vector.shape_cast %18 : vector<1x1x32xf32> to vector<1x32xf32>
    %20 = vector.shape_cast %17 : vector<1x32xf32> to vector<1x1x32xf32>
    tpu.vector_store %arg6[%c0_13, %c0_14, %c0_15], %20 {strides = array<i32>} : memref<1x1x32xf32, #tpu.memory_space<vmem>>, vector<1x1x32xf32>,
    return
  }
  func.func @transform_0(%arg0: i32, %arg1: i32) -> (i32, i32) {
    %c0_i32 = arith.constant 0 : i32
    %c0_i32_0 = arith.constant 0 : i32
    %c0_i32_1 = arith.constant 0 : i32
    return %c0_i32, %c0_i32_0 : i32, i32
  }
  func.func @transform_1(%arg0: i32, %arg1: i32) -> (i32, i32) {
    %c0_i32 = arith.constant 0 : i32
    %c0_i32_0 = arith.constant 0 : i32
    %c0_i32_1 = arith.constant 0 : i32
    return %c0_i32, %c0_i32_0 : i32, i32
  }
  func.func @transform_2(%arg0: i32, %arg1: i32) -> (i32, i32, i32) {
    %c0_i32 = arith.constant 0 : i32
    %c0_i32_0 = arith.constant 0 : i32
    return %arg0, %arg1, %c0_i32 : i32, i32, i32
  }
  func.func @transform_3(%arg0: i32, %arg1: i32) -> (i32, i32, i32) {
    %c0_i32 = arith.constant 0 : i32
    %c0_i32_0 = arith.constant 0 : i32
    return %arg0, %arg1, %c0_i32 : i32, i32, i32
  }
}

</mosaic_0001>

<bundles_post_ra>
// kernel: tpu_custom_call.1
= control target key start
LH: loop header
LB: loop body
LE: loop exit
PB: predicated region body
PF: predicated region fallthrough
CT: control target
= control target key end

     0   :  { %8 = vsyncpa [#allocation4], 0  ;;  %s691_s0 = inlined_call_operand.vmem [shape: f32[8,8], index: 0, kind: input, shape index: {}]   ;;  %s692_s1 = inlined_call_operand.vmem [shape: f32[8,1], index: 1, kind: input, shape index: {}]   ;;  %s693_s2 = inlined_call_operand.hbm [shape: f32[2,8,32], index: 2, kind: input, shape index: {}]   ;;  %s694_s3 = inlined_call_operand.hbm [shape: f32[2,8,32], index: 3, kind: output, shape index: {}]  }
   0x1   :  { %10 = vsyncpa [#allocation4 + $0x1], 0 }
   0x2   :  { %11 = vsyncpa [#allocation5], 0 }
   0x3   :  { %13 = vsyncpa [#allocation5 + $0x1], 0  ;;  %s565_s12 = smov 0   ;;  %s567_s13 = smov 0  }
   0x4   :  { %s569_s14 = smov 0   ;;  %s571_s15 = smov 0  }
   0x5   :  { %s573_s16 = smov 0   ;;  %s575_s17 = smov 0  }
   0x6 LB: > { %s349_s18 = sadd.s32 4294967295, %s541_s17   ;;  %s350_s19 = sadd.s32 4294967294, %s541_s17   ;;  %s541_s17 = sphi %s575_s17, %s19_s17   ;;  %s537_s16 = sphi %s573_s16, %s703_s16   ;;  %s533_s15 = sphi %s571_s15, %s702_s15   ;;  %s529_s14 = sphi %s569_s14, %s701_s14   ;;  %s525_s13 = sphi %s567_s13, %s700_s13   ;;  %s521_s12 = sphi %s565_s12, %s699_s12  }
   0x7   : > { %s31_s20 = sadd.s32 1, %s537_s16  ;;  %s82_s21 = sadd.s32 1, %s529_s14 }
   0x8   : > { %p33_p0 = scmp.ge.s32.totalorder %s31_s20, 2  ;;  %p89_p1 = scmp.ne.s32.totalorder %s529_s14, %s525_s13 }
   0x9   : > { %p90_p2 = scmp.eq.s32.totalorder %s541_s17, 0  ;;  %p95_p3 = scmp.ne.s32.totalorder %s525_s13, %s521_s12 }
   0xa   : > { %s705_s20 = smov (%p33_p0, %s31_s20), 0  ;;  %p96_p5 = scmp.eq.s32.totalorder %s349_s18, 0 }
   0xb   : > { %p606_p4 = por %p90_p2, %p89_p1  ;;  %s77_s23 = ssub.s32 %s537_s16, %s705_s20 }
   0xc   : > { %p121_p6 = scmp.eq.s32.totalorder %s349_s18, 1  ;;  %p80_p7 = scmp.eq.s32.totalorder %s77_s23, 0 }
   0xd   : > { %p612_p8 = por %p96_p5, %p95_p3  ;;  %p127_p10 = scmp.eq.s32.totalorder %s350_s19, 1 }
   0xe   : > { %p616_p9 = por %p121_p6, %p89_p1  ;;  %p352_p12 = scmp.ge.s32.totalorder %s541_s17, 2 }
   0xf   : > { %s621_s26 = scalar_select %p80_p7, %s529_s14, %s82_s21  }
  0x10   : > { %p623_p11 = por %p127_p10, %p95_p3  ;;  %p375_p13 = scmp.lt.s32.totalorder %s541_s17, 2 }
  0x11   : > { %s153_s28 = sand.u32 1, %s529_s14   ;;  %s354_s30 = sshll.u32 %s537_s16, 3 }
  0x12   : > { %s353_s29 = sshll.u32 %s153_s28, 3  ;;  %s162_s6 = scalar_lea.hbm %s693_s2, %s354_s30 }
  0x13   : > { %s157_s7 = scalar_lea.vmem [#allocation3], %s353_s29  ;;  %s164_s9 = sshll.u32 %s162_s6, 4  ;;  %s165_s9 = int_to_ptr.hbm [resolvable:$true] %s164_s9 }
  0x14   : > { %s166_s8 = sshll.u32 %s157_s7, 4  ;;  %p368_p0 = pnand %p375_p13, %p606_p4  ;;  %s167_s8 = int_to_ptr.vmem [resolvable:$true] %s166_s8 }
  0x15   : > { %p355_p1 = scmp.ge.s32.totalorder %s541_s17, 1  ;;  %p171_p2 = scmp.lt.s32.totalorder %s541_s17, 3 }
  0x16   : > { %s154_s10 = scalar_lea.sflag [#allocation4], %s153_s28 }
  0x17   : > { %370 = dma.hbm_to_vmem [thread:$0]  (!%p368_p0), %s165_s9, 128, %s167_s8, %s154_s10  }
  0x18   : > { %p172_p3 = pnand %p355_p1, %p171_p2 }
  0x19   : > { %s639_s11 = sand.u32 (!%p172_p3), 1, %s525_s13  }
  0x1a   : > { %175 = sbr.rel (%p172_p3) target bundleno = 166 (0xa6), region = 32  ;;  %s356_s18 = sshll.u32 (!%p172_p3), %s639_s11, 3 }
  0x1b   : > { %s178_s19 = scalar_lea.sflag (!%p172_p3), [#allocation4], %s639_s11  ;;  %s181_s21 = scalar_lea.vmem (!%p172_p3), [#allocation3], %s356_s18 }
  0x1f   : > { %512 = dma.done.wait (%p612_p8), %s178_s19, 128  }
  0x20   : > { %514 = vsyncadd (%p612_p8), %s178_s19, 4294967168  ;;  %vm209_vm0 = vcmask 253952   ;;  %v543_v0 = vmov 0.0   ;;  %v544_v1 = vmov 0   ;;  %vm224_vm1 = vcmask 64512   ;;  %v213_v2 = vld [vmem:[%s181_s21] sm:$0xff] }
  0x21   : > { %210 = vst.msk [vmem:[#allocation2] sm:$0x1] %vm209_vm0, %v543_v0  ;;  %427 = vset.pattern.permute.xlu0 %v544_v1  ;;  %v211_v3 = vld [vmem:[%s691_s0] sm:$0xff]  ;;  %243 = vmatpush.msra.mxu0 %v213_v2  ;;  %s360_s24 = sshll.u32 %s533_s15, 3  ;;  %s204_s6 = scalar_lea.vmem [#allocation6], %s356_s18  ;;  %vm250_vm2 = vcmask 261127  }
  0x22   : > { %v212_v4 = vld [vmem:[%s692_s1] sm:$0xff]  ;;  %358 = vmatmul.msk.f32.vlgmr.msra.gmra.mxu0 %vm224_vm1, %v211_v3  ;;  %s264_s5 = scalar_lea.hbm %s694_s3, %s360_s24  ;;  %s266_s7 = sshll.u32 %s204_s6, 4  ;;  %vm248_vm3 = vcmask 261120   ;;  %s267_s7 = int_to_ptr.vmem [resolvable:$true] %s266_s7 }
  0x23   : > { %217 = vperm.xlu0 %427, %v212_v4   ;;  %s268_s8 = sshll.u32 %s264_s5, 4  ;;  %s253_s9 = scalar_lea.sflag [#allocation5], %s639_s11  ;;  %s269_s8 = int_to_ptr.hbm [resolvable:$true] %s268_s8 }
  0x24   : > { %s473_s15 = sshra.s32 %s269_s8, 4  ;;  %s479_s21 = scalar_lea.hbm %s694_s3, 16  ;;  %s474_s15 = int_to_ptr.hbm [resolvable:$true] %s473_s15 }
  0x25   : > { %s475_s10 = scalar_lea.hbm %s474_s15, 8  ;;  %p480_p7 = scmp.lt.s32.totalorder %s474_s15, %s694_s3 }
  0x26   : > { %p476_p4 = scmp.ne.s32.totalorder %s474_s15, %s475_s10  ;;  %p481_p8 = scmp.lt.s32.totalorder %s479_s21, %s475_s10 }
  0x28   : > { %v428_v5 = vld [vmem:[#allocation2] ss:$0 sm:$0xff]  ;;  %p477_p5 = pnand %p476_p4, %p616_p9  ;;  %p482_p10 = por %p481_p8, %p480_p7 }
  0x2a   : > { %p478_p6 = pneg %p477_p5 }
  0x2c   : > { %p483_p13 = pnand %p482_p10, %p478_p6 }
  0x95   : > { %v218_v6 = vpop.permute.xlu0 %217 }
  0x96   : > { %v223_v7 = vmul.f32 %v428_v5, %v218_v6 }
  0x9f   : > { %v245_v8 = vpop.f32.mrf.mxu0 }
  0xa0   : > { %v246_v9 = vadd.f32 %v245_v8, %v223_v7 }
  0xa2   : > { %251 = vst.msk [vmem:[#allocation2 - $0x7] sm:$0x80] %vm250_vm2, %v246_v9 }
  0xa3   : > { %249 = vst.msk [vmem:[%s204_s6] sm:$0xff] %vm248_vm3, %v246_v9 }
  0xa4   : > { %486 = shalt.err (!%p483_p13)
}
  0xa5   : > { %365 = dma.vmem_to_hbm [thread:$0]  (%p616_p9), %s267_s7, 128, %s269_s8, %s253_s9  }
  0xa6 PF: > { %s280_s11 = sand.u32 1, %s521_s12   ;;  %p372_p0 = pnand %p352_p12, %p623_p11 }
  0xa7   : > { %s281_s28 = scalar_lea.sflag [#allocation5], %s280_s11 }
  0xa8   : > { %p373_p1 = pneg %p372_p0 }
  0xaa   : > { %516 = dma.done.wait (%p373_p1), %s281_s28, 128  }
  0xab   : > { %518 = vsyncadd (%p373_p1), %s281_s28, 4294967168  ;;  %s19_s17 = sadd.s32 1, %s541_s17   ;;  %s699_s12 = smov %s525_s13 }
  0xac   : > { %p16_p2 = scmp.ge.s32.totalorder %s19_s17, 4   ;;  %s700_s13 = smov %s529_s14 }
  0xad   : > { %s701_s14 = smov %s621_s26  ;;  %s702_s15 = smov %s537_s16 }
  0xae   : > { %s703_s16 = smov %s705_s20  ;;  %18 = sbr.rel (!%p16_p2) target bundleno = 6 (0x6), region = 81 }
  0xb3   :  { %287 = vsyncpa [#allocation4], 1 }
  0xb4   :  { %289 = vsyncpa [#allocation4 + $0x1], 1 }
  0xb5   :  { %290 = vsyncpa [#allocation5], 1 }
  0xb6   :  { %292 = vsyncpa [#allocation5 + $0x1], 1 }

</bundles_post_ra>
